<compile_context>
chip_gen: v5e
topology: v5e:2x2
jax: 0.10.0
libtpu: 0.0.40
codegen_flags: <defaults>
</compile_context>

<pallas_src>
import jax
import jax.numpy as jnp
from jax.experimental import pallas as pl
from jax.experimental.pallas import tpu as pltpu


_LANE = 128


def _round_up(x, m):
    return (x + m - 1) // m * m


def _xi_kernel(x_ref, w_ref, b_ref, o_ref):
    # One MXU pass per (block_m, 128) output tile (full-f32 precision),
    # bias broadcast-add on the VPU, tanh on the EUP.
    acc = jnp.dot(
        x_ref[...],
        w_ref[...],
        preferred_element_type=jnp.float32,
        precision=jax.lax.Precision.HIGHEST,
    )
    o_ref[...] = jnp.tanh(acc + b_ref[...]).astype(o_ref.dtype)


def prepare_xi_params(weight_t, bias):
    """One-time weight/bias prep: lane-pad the output dim to 128.

    weight_t: (in_f, out_f)  -- transpose of torch nn.Linear's (out_f, in_f)
    bias:     (out_f,)
    returns:  w_pad (in_f, n_pad) f32, b_pad (1, n_pad) f32
    """
    in_f, out_f = weight_t.shape
    n_pad = _round_up(out_f, _LANE)
    w_pad = jnp.zeros((in_f, n_pad), jnp.float32)
    w_pad = w_pad.at[:, :out_f].set(weight_t.astype(jnp.float32))
    b_pad = jnp.zeros((1, n_pad), jnp.float32)
    b_pad = b_pad.at[:, :out_f].set(bias.astype(jnp.float32).reshape(1, out_f))
    return w_pad, b_pad


def xi_forward(x, w_pad, b_pad, s, *, block_m=512):
    """tanh(x @ W^T + b) -> (bs, s, s). x: (bs, 2*ln+10) f32."""
    bs, in_f = x.shape
    out_f = s * s
    assert w_pad.shape[0] == in_f, (
        "w_pad rows must equal x feature dim (did prepare_xi_params use the "
        "same in_features?)")
    n_pad = w_pad.shape[1]

    # Small batch: single grid step over the full array (no padding at all).
    # Large batch: 1-D grid over big batch tiles (block_m=512 amortizes the
    # ~0.35 us/step grid overhead; tiles stay far under VMEM limits even on
    # v7x's 64 MiB).
    if bs <= block_m:
        bm = bs
        bs_pad = bs
        x_in = x
    else:
        bm = block_m
        bs_pad = _round_up(bs, bm)
        x_in = jnp.pad(x, ((0, bs_pad - bs), (0, 0)))
    grid_m = bs_pad // bm

    itemsize = 4
    cost = pl.CostEstimate(
        flops=2 * bs_pad * in_f * n_pad,
        transcendentals=bs_pad * n_pad,
        bytes_accessed=(bs_pad * in_f + in_f * n_pad + n_pad + bs_pad * n_pad)
        * itemsize,
    )

    out = pl.pallas_call(
        _xi_kernel,
        out_shape=jax.ShapeDtypeStruct((bs_pad, n_pad), jnp.float32),
        grid=(grid_m,),
        in_specs=[
            pl.BlockSpec((bm, in_f), lambda i: (i, 0)),
            pl.BlockSpec((in_f, n_pad), lambda i: (0, 0)),
            pl.BlockSpec((1, n_pad), lambda i: (0, 0)),
        ],
        out_specs=pl.BlockSpec((bm, n_pad), lambda i: (i, 0)),
        compiler_params=pltpu.CompilerParams(
            dimension_semantics=("parallel",)),
        cost_estimate=cost,
    )(x_in, w_pad, b_pad)

    # One fused slice+reshape outside the kernel (lane padding + batch padding
    # removed, then the torch .view(bs, s, s)).
    return out[:bs, :out_f].reshape(bs, s, s)


def make_xi_params(key, ln, s):
    """Deterministic synthetic parameters matching nn.Linear(2*ln+10, s**2)."""
    in_f = 2 * ln + 10
    out_f = s * s
    kw, kb = jax.random.split(key)
    bound = 1.0 / jnp.sqrt(in_f)
    # PyTorch stores weight as (out_f, in_f); we keep the transpose (in_f, out_f).
    weight_t = jax.random.uniform(kw, (in_f, out_f), jnp.float32, -bound, bound)
    bias = jax.random.uniform(kb, (out_f,), jnp.float32, -bound, bound)
    return weight_t, bias


if __name__ == "__main__":
    ln = 16           # -> in_features = 2*16 + 10 = 42
    s = 8             # -> out_features = 64
    bs = 8

    key = jax.random.PRNGKey(0)
    kx, kp = jax.random.split(key)
    in_f = 2 * ln + 10
    x = jax.random.normal(kx, (bs, in_f), jnp.float32)
    weight_t, bias = make_xi_params(kp, ln, s)

    w_pad, b_pad = prepare_xi_params(weight_t, bias)    # one-time param prep
    out = xi_forward(x, w_pad, b_pad, s)
    out = jax.block_until_ready(out)

    # Reference in plain JAX (same math as torch Linear + tanh + view), using
    # full-precision matmul to match the kernel's HIGHEST-precision MXU path.
    ref = jnp.tanh(
        jnp.dot(x, weight_t, precision=jax.lax.Precision.HIGHEST)
        + bias[None, :]
    ).reshape(bs, s, s)
    assert out.shape == (bs, s, s)
    assert jnp.allclose(out, ref, atol=1e-5, rtol=1e-5)

    print("KERNEL_OK")
</pallas_src>

<mosaic_0001>
module attributes {stable_mosaic.version = 11 : i64} {
  func.func @_xi_kernel(%arg0: i32, %arg1: memref<8x42xf32, #tpu.memory_space<vmem>>, %arg2: memref<42x128xf32, #tpu.memory_space<vmem>>, %arg3: memref<1x128xf32, #tpu.memory_space<vmem>>, %arg4: memref<8x128xf32, #tpu.memory_space<vmem>>) attributes {dimension_semantics = [#tpu.dimension_semantics<parallel>], iteration_bounds = array<i64: 1>, scalar_prefetch = 0 : i64, scratch_operands = 0 : i64, tpu.core_type = #tpu.core_type<tc>, window_params = [{transform_indices = @transform_0, window_bounds = array<i64: 8, 42>}, {pipeline_mode = #tpu.pipeline_mode<synchronous>, transform_indices = @transform_1, window_bounds = array<i64: 42, 128>}, {pipeline_mode = #tpu.pipeline_mode<synchronous>, transform_indices = @transform_2, window_bounds = array<i64: 1, 128>}, {transform_indices = @transform_3, window_bounds = array<i64: 8, 128>}]} {
    %c0 = arith.constant 0 : index
    %c0_0 = arith.constant 0 : index
    %0 = vector.load %arg1[%c0, %c0_0] : memref<8x42xf32, #tpu.memory_space<vmem>>, vector<8x42xf32>
    %c0_1 = arith.constant 0 : index
    %c0_2 = arith.constant 0 : index
    %1 = vector.load %arg2[%c0_1, %c0_2] : memref<42x128xf32, #tpu.memory_space<vmem>>, vector<42x128xf32>
    %cst = arith.constant dense<0.000000e+00> : vector<8x128xf32>
    %2 = tpu.matmul %0, %1, %cst {dimension_numbers = #tpu.dot_dimension_numbers<[1], [0], [0], [1], [0, 0, 1, 1], [], []>, precision = #tpu.contract_precision<fp32>} : vector<8x42xf32>, vector<42x128xf32>, vector<8x128xf32> -> vector<8x128xf32>
    %c0_3 = arith.constant 0 : index
    %c0_4 = arith.constant 0 : index
    %3 = vector.load %arg3[%c0_3, %c0_4] : memref<1x128xf32, #tpu.memory_space<vmem>>, vector<1x128xf32>
    %4 = vector.broadcast %3 : vector<1x128xf32> to vector<8x128xf32>
    %5 = arith.addf %2, %4 : vector<8x128xf32>
    %6 = math.tanh %5 : vector<8x128xf32>
    %c0_5 = arith.constant 0 : index
    %c0_6 = arith.constant 0 : index
    %7 = vector.load %arg4[%c0_5, %c0_6] : memref<8x128xf32, #tpu.memory_space<vmem>>, vector<8x128xf32>
    tpu.vector_store %arg4[%c0_5, %c0_6], %6 {strides = array<i32>} : memref<8x128xf32, #tpu.memory_space<vmem>>, vector<8x128xf32>,
    return
  }
  func.func @transform_0(%arg0: i32) -> (i32, i32) {
    %c0_i32 = arith.constant 0 : i32
    %c0_i32_0 = arith.constant 0 : i32
    return %arg0, %c0_i32 : i32, i32
  }
  func.func @transform_1(%arg0: i32) -> (i32, i32) {
    %c0_i32 = arith.constant 0 : i32
    %c0_i32_0 = arith.constant 0 : i32
    %c0_i32_1 = arith.constant 0 : i32
    return %c0_i32, %c0_i32_0 : i32, i32
  }
  func.func @transform_2(%arg0: i32) -> (i32, i32) {
    %c0_i32 = arith.constant 0 : i32
    %c0_i32_0 = arith.constant 0 : i32
    %c0_i32_1 = arith.constant 0 : i32
    return %c0_i32, %c0_i32_0 : i32, i32
  }
  func.func @transform_3(%arg0: i32) -> (i32, i32) {
    %c0_i32 = arith.constant 0 : i32
    %c0_i32_0 = arith.constant 0 : i32
    return %arg0, %c0_i32 : i32, i32
  }
}

</mosaic_0001>

<bundles_post_ra>
// kernel: tpu_custom_call.1
= control target key start
LH: loop header
LB: loop body
LE: loop exit
PB: predicated region body
PF: predicated region fallthrough
CT: control target
= control target key end

     0   :  { %8 = vsyncpa [#allocation3], 0  ;;  %s454_s0 = inlined_call_operand.hbm [shape: f32[8,42], index: 0, kind: input, shape index: {}]   ;;  %s455_s1 = inlined_call_operand.hbm [shape: f32[42,128], index: 1, kind: input, shape index: {}]   ;;  %s456_s2 = inlined_call_operand.vmem [shape: f32[1,128], index: 2, kind: input, shape index: {}]   ;;  %s457_s3 = inlined_call_operand.hbm [shape: f32[8,128], index: 3, kind: output, shape index: {}]  }
   0x1   :  { %9 = vsyncpa [#allocation6], 0 }
   0x2   :  { %10 = vsyncpa [#allocation4], 0  ;;  %s16_s14 = sshll.u32 %s454_s0, 4  ;;  %s381_s15 = smov [#allocation2]   ;;  %s17_s14 = int_to_ptr.hbm [resolvable:$true] %s16_s14 }
   0x3   :  { %s18_s16 = sshll.u32 %s381_s15, 4  ;;  %s26_s19 = sshll.u32 %s455_s1, 4  ;;  %s19_s16 = int_to_ptr.vmem [resolvable:$true] %s18_s16  ;;  %s27_s19 = int_to_ptr.hbm [resolvable:$true] %s26_s19 }
   0x4   :  { %21 = dma.hbm_to_vmem [thread:$0]  %s17_s14, 128, %s19_s16, [#allocation3]  }
   0x5   :  { %s382_s20 = smov [#allocation5]   ;;  %s383_s22 = smov 128  }
   0x6   :  { %s28_s21 = sshll.u32 %s382_s20, 4  ;;  %s384_s23 = smov 8   ;;  %s29_s21 = int_to_ptr.vmem [resolvable:$true] %s28_s21 }
   0x7   :  { %34 = dma.hbm_to_vmem [thread:$0]  %s27_s19, 768, %s29_s21, [#allocation6], %s383_s22, %s383_s22, %s384_s23  }
   0x8   :  { %375 = dma.done.wait [#allocation3], 128  }
   0x9   :  { %376 = vsyncadd [#allocation3], 4294967168 }
   0xa   :  { %377 = dma.done.wait [#allocation6], 768  }
   0xb   :  { %378 = vsyncadd [#allocation6], 4294966528  ;;  %vm60_vm0 = vcmask 1041408   ;;  %v51_v0 = vld [vmem:[#allocation5 + $0x28] sm:$0x3]  ;;  %v50_v1 = vld [vmem:[#allocation5 + $0x20] sm:$0xff] }
   0xc   :  { %v49_v2 = vld [vmem:[#allocation5 + $0x18] sm:$0xff]  ;;  %vm56_vm1 = vcmask 343040   ;;  %v62_v3 = vsel %vm60_vm0, %v51_v0, 0  ;;  %v412_v4 = vand.u32 4294901760, %v50_v1  ;;  %v48_v6 = vld [vmem:[#allocation5 + $0x10] sm:$0xff]  ;;  %v47_v7 = vld [vmem:[#allocation5 + $0x8] sm:$0xff] }
   0xd   :  { %v414_v5 = vand.u32 4294901760, %v49_v2  ;;  %v46_v8 = vld [vmem:[#allocation5] sm:$0xff]  ;;  %v416_v9 = vand.u32 4294901760, %v62_v3  ;;  %v418_v10 = vand.u32 4294901760, %v48_v6  ;;  %v420_v11 = vand.u32 4294901760, %v47_v7  ;;  %v45_v13 = vld [vmem:[#allocation2] sm:$0xff] }
   0xe   :  { %v422_v12 = vand.u32 4294901760, %v46_v8  ;;  %v112_v14 = vsub.f32 %v50_v1, %v412_v4  ;;  %v58_v16 = vsel %vm56_vm1, %v45_v13, 0  ;;  %v300_v44 = vld [vmem:[%s456_s2] ss:$0 sm:$0xff]  ;;  %s385_s24 = smov [#allocation7]   ;;  %s284_s28 = sshll.u32 %s457_s3, 4  ;;  %s285_s28 = int_to_ptr.hbm [resolvable:$true] %s284_s28 }
   0xf   :  { %v118_v15 = vsub.f32 %v49_v2, %v414_v5  ;;  %75 = vmatpush.msra.mxu0 %v416_v9  ;;  %v106_v17 = vsub.f32 %v62_v3, %v416_v9  ;;  %191 = vmatpush.msra.mxu3 %v416_v9  ;;  %v124_v18 = vsub.f32 %v48_v6, %v418_v10  ;;  %v86_v20 = vand.u32 4294901760, %v58_v16  ;;  %s282_s25 = sshll.u32 %s385_s24, 4  ;;  %s283_s25 = int_to_ptr.vmem [resolvable:$true] %s282_s25 }
  0x10   :  { %v130_v19 = vsub.f32 %v47_v7, %v420_v11  ;;  %v113_v21 = vand.u32 4294901760, %v112_v14  ;;  %v136_v23 = vsub.f32 %v46_v8, %v422_v12 }
  0x11   :  { %v119_v22 = vand.u32 4294901760, %v118_v15  ;;  %158 = vmatpush.msra.mxu2 %v106_v17  ;;  %77 = vmatpush.msra.mxu0 %v412_v4  ;;  %v107_v24 = vand.u32 4294901760, %v106_v17  ;;  %v125_v25 = vand.u32 4294901760, %v124_v18  ;;  %v87_v26 = vsub.f32 %v58_v16, %v86_v20 }
  0x12   :  { %v114_v27 = vsub.f32 %v112_v14, %v113_v21  ;;  %193 = vmatpush.msra.mxu3 %v412_v4  ;;  %v131_v30 = vand.u32 4294901760, %v130_v19  ;;  %v137_v32 = vand.u32 4294901760, %v136_v23 }
  0x13   :  { %v108_v28 = vsub.f32 %v106_v17, %v107_v24  ;;  %161 = vmatpush.msra.mxu2 %v112_v14  ;;  %79 = vmatpush.msra.mxu0 %v414_v5  ;;  %v120_v29 = vsub.f32 %v118_v15, %v119_v22  ;;  %v88_v31 = vand.u32 4294901760, %v87_v26  ;;  %v126_v35 = vsub.f32 %v124_v18, %v125_v25 }
  0x14   :  { %195 = vmatpush.msra.mxu3 %v414_v5  ;;  %v115_v34 = vand.u32 4294901760, %v114_v27  ;;  %v132_v38 = vsub.f32 %v130_v19, %v131_v30  ;;  %v138_v40 = vsub.f32 %v136_v23, %v137_v32 }
  0x15   :  { %v109_v33 = vand.u32 4294901760, %v108_v28  ;;  %164 = vmatpush.msra.mxu2 %v118_v15  ;;  %81 = vmatpush.msra.mxu0 %v418_v10  ;;  %v89_v36 = vsub.f32 %v87_v26, %v88_v31  ;;  %v121_v37 = vand.u32 4294901760, %v120_v29  ;;  %v127_v39 = vand.u32 4294901760, %v126_v35 }
  0x16   :  { %197 = vmatpush.msra.mxu3 %v418_v10  ;;  %v133_v42 = vand.u32 4294901760, %v132_v38  ;;  %v139_v43 = vand.u32 4294901760, %v138_v40 }
  0x17   :  { %110 = vmatpush.msra.mxu1 %v109_v33  ;;  %167 = vmatpush.msra.mxu2 %v124_v18  ;;  %v90_v41 = vand.u32 4294901760, %v89_v36 }
  0x18   :  { %83 = vmatpush.msra.mxu0 %v420_v11  ;;  %199 = vmatpush.msra.mxu3 %v420_v11 }
  0x19   :  { %116 = vmatpush.msra.mxu1 %v115_v34  ;;  %170 = vmatpush.msra.mxu2 %v130_v19 }
  0x1a   :  { %85 = vmatpush.msra.mxu0 %v422_v12  ;;  %201 = vmatpush.msra.mxu3 %v422_v12 }
  0x1b   :  { %122 = vmatpush.msra.mxu1 %v121_v37  ;;  %173 = vmatpush.msra.mxu2 %v136_v23 }
  0x1c   :  { %222 = vmatpush.msrb.mxu0 %v107_v24  ;;  %176 = vmatmul.f32.vlgmr.msra.gmra.mxu2 %v87_v26 }
  0x1d   :  { %128 = vmatpush.msra.mxu1 %v127_v39  ;;  %91 = vmatmul.f32.vlgmr.msra.gmra.mxu0 %v90_v41 }
  0x1e   :  { %226 = vmatpush.msrb.mxu0 %v113_v21  ;;  %205 = vmatmul.f32.vlgmr.msra.gmra.mxu3 %v88_v31 }
  0x1f   :  { %134 = vmatpush.msra.mxu1 %v133_v42 }
  0x20   :  { %230 = vmatpush.msrb.mxu0 %v119_v22 }
  0x21   :  { %140 = vmatpush.msra.mxu1 %v139_v43 }
  0x22   :  { %234 = vmatpush.msrb.mxu0 %v125_v25  ;;  %142 = vmatmul.f32.vlgmr.msra.gmra.mxu1 %v86_v20 }
  0x23   :  { %259 = vmatpush.msrb.mxu1 %v416_v9 }
  0x24   :  { %238 = vmatpush.msrb.mxu0 %v131_v30 }
  0x25   :  { %261 = vmatpush.msrb.mxu1 %v412_v4 }
  0x26   :  { %242 = vmatpush.msrb.mxu0 %v137_v32 }
  0x27   :  { %263 = vmatpush.msrb.mxu1 %v414_v5  ;;  %244 = vmatmul.f32.vlgmr.msrb.gmra.mxu0 %v86_v20 }
  0x29   :  { %265 = vmatpush.msrb.mxu1 %v418_v10 }
  0x2b   :  { %267 = vmatpush.msrb.mxu1 %v420_v11 }
  0x2d   :  { %269 = vmatpush.msrb.mxu1 %v422_v12 }
  0x2e   :  { %271 = vmatmul.f32.vlgmr.msrb.gmra.mxu1 %v86_v20 }
  0x9a   :  { %v92_v45 = vpop.f32.mrf.mxu0 }
  0x9b   :  { %v93_v46 = vadd.f32 %v300_v44, %v92_v45 }
  0x9f   :  { %v143_v47 = vpop.f32.mrf.mxu1  ;;  %v177_v48 = vpop.f32.mrf.mxu2 }
  0xa0   :  { %v144_v49 = vadd.f32 %v143_v47, %v93_v46 }
  0xa1   :  { %v206_v50 = vpop.f32.mrf.mxu3 }
  0xa2   :  { %v178_v51 = vadd.f32 %v177_v48, %v144_v49 }
  0xa4   :  { %v245_v52 = vpop.f32.mrf.mxu0  ;;  %v207_v53 = vadd.f32 %v206_v50, %v178_v51 }
  0xa6   :  { %v246_v54 = vadd.f32 %v245_v52, %v207_v53 }
  0xab   :  { %v272_v55 = vpop.f32.mrf.mxu1 }
  0xac   :  { %v273_v56 = vadd.f32 %v272_v55, %v246_v54 }
  0xae   :  { %301 = vtanh.f32 %v273_v56 }
  0xb4   :  { %v302_v57 = vpop.eup %301 }
  0xb5   :  { %276 = vst [vmem:[#allocation7] sm:$0xff] %v302_v57 }
  0xb6   :  { %287 = dma.vmem_to_hbm [thread:$0]  %s283_s25, 128, %s285_s28, [#allocation4]  }
  0xb7   :  { %379 = dma.done.wait [#allocation4], 128  }
  0xb8   :  { %380 = vsyncadd [#allocation4], 4294967168 }
  0xb9   :  { %292 = vsyncpa [#allocation3], 1 }
  0xba   :  { %293 = vsyncpa [#allocation6], 1 }
  0xbb   :  { %294 = vsyncpa [#allocation4], 1 }

</bundles_post_ra>
